<compile_context>
chip_gen: v7x
topology: tpu7x:2x2x1
jax: 0.10.0
libtpu: 0.0.40
codegen_flags: <defaults>
</compile_context>

<pallas_src>
import functools

import jax
import jax.numpy as jnp
from jax.experimental import pallas as pl
from jax.experimental.pallas import tpu as pltpu


def _round_up(x: int, m: int) -> int:
    return ((x + m - 1) // m) * m


def _linear_kernel(x_ref, w_ref, b_ref, o_ref, acc_ref):
    """One (tm, tn) output tile, accumulated over the K grid axis."""
    k = pl.program_id(2)

    @pl.when(k == 0)
    def _():
        acc_ref[...] = jnp.zeros_like(acc_ref)

    # MXU matmul with f32 accumulation.
    acc_ref[...] += jnp.dot(
        x_ref[...], w_ref[...], preferred_element_type=jnp.float32
    )

    @pl.when(k == pl.num_programs(2) - 1)
    def _():
        # Bias added once, in f32, then a single cast on the final store.
        o_ref[...] = (acc_ref[...] + b_ref[...]).astype(o_ref.dtype)


@functools.partial(jax.jit, static_argnames=("tm", "tn", "tk", "compute_dtype"))
def classifier_head_forward(
    x, weight_t, bias, *, tm: int = 128, tn: int = 512, tk: int = 512,
    compute_dtype=None,
):
    """y = x @ weight_t + bias   (equivalent to torch nn.Linear forward).

    x:        [B, input_dim]
    weight_t: [input_dim, num_classes]  (PyTorch weight is [num_classes, input_dim])
    bias:     [num_classes]
    returns   [B, num_classes]

    compute_dtype: e.g. jnp.bfloat16 on v6e/v7x to use the fast bf16 MXU path
                   (accumulation stays f32); None keeps the input dtype.
    """
    B, D = x.shape
    D2, C = weight_t.shape
    assert D == D2 and bias.shape == (C,)

    out_dtype = x.dtype
    if compute_dtype is not None:
        x = x.astype(compute_dtype)
        weight_t = weight_t.astype(compute_dtype)

    # --- Pad everything to tile-aligned, lane/sublane-friendly shapes. -------
    # Batch (sublane axis of x and of the output): multiple of 8.
    B_pad = _round_up(B, 8)
    tm = min(tm, B_pad)
    B_pad = _round_up(B_pad, tm)
    # Features (lane axis of x, sublane axis of W): multiple of 128.
    D_pad = _round_up(D, 128)
    tk = min(tk, D_pad)
    D_pad = _round_up(D_pad, tk)
    # Classes (lane axis of W / bias / output): multiple of 128 -> unmasked vst.
    C_pad = _round_up(C, 128)
    tn = min(tn, C_pad)
    C_pad = _round_up(C_pad, tn)

    x_p = jnp.pad(x, ((0, B_pad - B), (0, D_pad - D)))
    w_p = jnp.pad(weight_t, ((0, D_pad - D), (0, C_pad - C)))
    b_p = jnp.pad(bias.astype(jnp.float32), (0, C_pad - C)).reshape(1, C_pad)

    grid = (B_pad // tm, C_pad // tn, D_pad // tk)  # (M, N, K) — reduction last.

    bytes_accessed = (
        x_p.size * x_p.dtype.itemsize
        + w_p.size * w_p.dtype.itemsize
        + b_p.size * b_p.dtype.itemsize
        + B_pad * C_pad * jnp.dtype(out_dtype).itemsize
    )
    cost = pl.CostEstimate(
        flops=2 * B_pad * D_pad * C_pad,
        transcendentals=0,
        bytes_accessed=bytes_accessed,
    )

    out_padded = pl.pallas_call(
        _linear_kernel,
        out_shape=jax.ShapeDtypeStruct((B_pad, C_pad), out_dtype),
        grid_spec=pltpu.PrefetchScalarGridSpec(
            num_scalar_prefetch=0,
            grid=grid,
            in_specs=[
                pl.BlockSpec((tm, tk), lambda i, j, k: (i, k)),   # x tile
                pl.BlockSpec((tk, tn), lambda i, j, k: (k, j)),   # W tile
                pl.BlockSpec((1, tn), lambda i, j, k: (0, j)),    # bias tile
            ],
            out_specs=pl.BlockSpec((tm, tn), lambda i, j, k: (i, j)),
            scratch_shapes=[pltpu.VMEM((tm, tn), jnp.float32)],
        ),
        compiler_params=pltpu.CompilerParams(
            dimension_semantics=("parallel", "parallel", "arbitrary"),
        ),
        cost_estimate=cost,
    )(x_p, w_p, b_p)

    return out_padded[:B, :C]


if __name__ == "__main__":
    key = jax.random.PRNGKey(0)

    # ---- Small shapes consistent with the module (ClassifierHead defaults) ----
    input_dim, num_classes, batch = 32, 1, 2
    kx, kw, kb = jax.random.split(key, 3)
    bound = 1.0 / jnp.sqrt(jnp.float32(input_dim))
    # PyTorch weight is [num_classes, input_dim]; we store it transposed.
    weight_t = jax.random.uniform(
        kw, (input_dim, num_classes), jnp.float32, minval=-bound, maxval=bound
    )
    bias = jax.random.uniform(
        kb, (num_classes,), jnp.float32, minval=-bound, maxval=bound
    )
    x = jax.random.normal(kx, (batch, input_dim), jnp.float32)

    y = classifier_head_forward(x, weight_t, bias)
    y = jax.block_until_ready(y)
    y_ref = x @ weight_t + bias[None, :]
    assert y.shape == (batch, num_classes)
    assert jnp.allclose(y, y_ref, atol=1e-5, rtol=1e-5)

    # ---- Larger shapes to exercise the tiled (M, N, K) accumulator path ----
    B2, D2_, C2 = 16, 1024, 640
    k2x, k2w, k2b = jax.random.split(jax.random.PRNGKey(1), 3)
    bound2 = 1.0 / jnp.sqrt(jnp.float32(D2_))
    w2 = jax.random.uniform(k2w, (D2_, C2), jnp.float32, minval=-bound2, maxval=bound2)
    b2 = jax.random.uniform(k2b, (C2,), jnp.float32, minval=-bound2, maxval=bound2)
    x2 = jax.random.normal(k2x, (B2, D2_), jnp.float32)

    y2 = jax.block_until_ready(classifier_head_forward(x2, w2, b2))
    y2_ref = x2 @ w2 + b2[None, :]
    assert y2.shape == (B2, C2)
    assert jnp.allclose(y2, y2_ref, atol=1e-4, rtol=1e-4)

    print("KERNEL_OK")
</pallas_src>

<mosaic_0001>
module attributes {stable_mosaic.version = 11 : i64} {
  func.func @_linear_kernel(%arg0: i32, %arg1: i32, %arg2: i32, %arg3: memref<8x128xf32, #tpu.memory_space<vmem>>, %arg4: memref<128x128xf32, #tpu.memory_space<vmem>>, %arg5: memref<1x128xf32, #tpu.memory_space<vmem>>, %arg6: memref<8x128xf32, #tpu.memory_space<vmem>>, %arg7: memref<8x128xf32, #tpu.memory_space<vmem>>) attributes {dimension_semantics = [#tpu.dimension_semantics<parallel>, #tpu.dimension_semantics<parallel>, #tpu.dimension_semantics<arbitrary>], iteration_bounds = array<i64: 1, 1, 1>, scalar_prefetch = 0 : i64, scratch_operands = 1 : i64, tpu.core_type = #tpu.core_type<tc>, window_params = [{transform_indices = @transform_0, window_bounds = array<i64: 8, 128>}, {transform_indices = @transform_1, window_bounds = array<i64: 128, 128>}, {transform_indices = @transform_2, window_bounds = array<i64: 1, 128>}, {transform_indices = @transform_3, window_bounds = array<i64: 8, 128>}]} {
    %c0_i32 = arith.constant 0 : i32
    %0 = arith.cmpi eq, %arg2, %c0_i32 : i32
    %1 = arith.extui %0 : i1 to i32
    %c0_i32_0 = arith.constant 0 : i32
    %2 = arith.cmpi ne, %1, %c0_i32_0 : i32
    scf.if %2 {
      %cst_10 = arith.constant 0.000000e+00 : f32
      %12 = vector.broadcast %cst_10 : f32 to vector<8x128xf32>
      %c0_11 = arith.constant 0 : index
      %c0_12 = arith.constant 0 : index
      %13 = vector.load %arg7[%c0_11, %c0_12] : memref<8x128xf32, #tpu.memory_space<vmem>>, vector<8x128xf32>
      tpu.vector_store %arg7[%c0_11, %c0_12], %12 {strides = array<i32>} : memref<8x128xf32, #tpu.memory_space<vmem>>, vector<8x128xf32>,
    } else {
    }
    %c0 = arith.constant 0 : index
    %c0_1 = arith.constant 0 : index
    %3 = vector.load %arg7[%c0, %c0_1] : memref<8x128xf32, #tpu.memory_space<vmem>>, vector<8x128xf32>
    %c0_2 = arith.constant 0 : index
    %c0_3 = arith.constant 0 : index
    %4 = vector.load %arg3[%c0_2, %c0_3] : memref<8x128xf32, #tpu.memory_space<vmem>>, vector<8x128xf32>
    %c0_4 = arith.constant 0 : index
    %c0_5 = arith.constant 0 : index
    %5 = vector.load %arg4[%c0_4, %c0_5] : memref<128x128xf32, #tpu.memory_space<vmem>>, vector<128x128xf32>
    %cst = arith.constant dense<0.000000e+00> : vector<8x128xf32>
    %6 = tpu.matmul %4, %5, %cst {dimension_numbers = #tpu.dot_dimension_numbers<[1], [0], [0], [1], [0, 0, 1, 1], [], []>} : vector<8x128xf32>, vector<128x128xf32>, vector<8x128xf32> -> vector<8x128xf32>
    %7 = arith.addf %3, %6 : vector<8x128xf32>
    %c0_6 = arith.constant 0 : index
    %c0_7 = arith.constant 0 : index
    %8 = vector.load %arg7[%c0_6, %c0_7] : memref<8x128xf32, #tpu.memory_space<vmem>>, vector<8x128xf32>
    tpu.vector_store %arg7[%c0_6, %c0_7], %7 {strides = array<i32>} : memref<8x128xf32, #tpu.memory_space<vmem>>, vector<8x128xf32>,
    %c0_i32_8 = arith.constant 0 : i32
    %9 = arith.cmpi eq, %arg2, %c0_i32_8 : i32
    %10 = arith.extui %9 : i1 to i32
    %c0_i32_9 = arith.constant 0 : i32
    %11 = arith.cmpi ne, %10, %c0_i32_9 : i32
    scf.if %11 {
      %c0_10 = arith.constant 0 : index
      %c0_11 = arith.constant 0 : index
      %12 = vector.load %arg7[%c0_10, %c0_11] : memref<8x128xf32, #tpu.memory_space<vmem>>, vector<8x128xf32>
      %c0_12 = arith.constant 0 : index
      %c0_13 = arith.constant 0 : index
      %13 = vector.load %arg5[%c0_12, %c0_13] : memref<1x128xf32, #tpu.memory_space<vmem>>, vector<1x128xf32>
      %14 = vector.broadcast %13 : vector<1x128xf32> to vector<8x128xf32>
      %15 = arith.addf %12, %14 : vector<8x128xf32>
      %c0_14 = arith.constant 0 : index
      %c0_15 = arith.constant 0 : index
      %16 = vector.load %arg6[%c0_14, %c0_15] : memref<8x128xf32, #tpu.memory_space<vmem>>, vector<8x128xf32>
      tpu.vector_store %arg6[%c0_14, %c0_15], %15 {strides = array<i32>} : memref<8x128xf32, #tpu.memory_space<vmem>>, vector<8x128xf32>,
    } else {
    }
    return
  }
  func.func @transform_0(%arg0: i32, %arg1: i32, %arg2: i32) -> (i32, i32) {
    %c0_i32 = arith.constant 0 : i32
    return %arg0, %arg2 : i32, i32
  }
  func.func @transform_1(%arg0: i32, %arg1: i32, %arg2: i32) -> (i32, i32) {
    %c0_i32 = arith.constant 0 : i32
    return %arg2, %arg1 : i32, i32
  }
  func.func @transform_2(%arg0: i32, %arg1: i32, %arg2: i32) -> (i32, i32) {
    %c0_i32 = arith.constant 0 : i32
    %c0_i32_0 = arith.constant 0 : i32
    return %c0_i32, %arg1 : i32, i32
  }
  func.func @transform_3(%arg0: i32, %arg1: i32, %arg2: i32) -> (i32, i32) {
    %c0_i32 = arith.constant 0 : i32
    return %arg0, %arg1 : i32, i32
  }
}

</mosaic_0001>

<bundles_post_ra>
// kernel: classifier_head_forward.1
= control target key start
LH: loop header
LB: loop body
LE: loop exit
PB: predicated region body
PF: predicated region fallthrough
CT: control target
= control target key end

     0   :  { %v206_v0 = vmov 0.0|0.0   ;;  %vm207_vm0 = vmmov 0   ;;  %v208_v4 = vmov 0.0   ;;  %s286_s1 = inlined_call_operand.vmem [shape: f32[128,128], index: 1, kind: input, shape index: {}]   ;;  %s287_s0 = inlined_call_operand.vmem [shape: f32[8,128], index: 0, kind: input, shape index: {}]   ;;  %s288_s2 = inlined_call_operand.vmem [shape: f32[1,128], index: 2, kind: input, shape index: {}]   ;;  %s289_s3 = inlined_call_operand.vmem [shape: f32[8,128], index: 3, kind: output, shape index: {}]  }
   0x1   :  { %179 = vmatprep.subr.bf16.mxu0 %v206_v0  ;;  %v21_v1 = vld [vmem:[%s286_s1] sm:$0xff]  ;;  %v22_v2 = vld [vmem:[%s286_s1 + $0x8] sm:$0xff]  ;;  %v23_v3 = vld [vmem:[%s286_s1 + $0x10] sm:$0xff]  ;;  %176 = vmatprep.mubr.msk.f32.mxu0 %vm207_vm0, %v208_v4 }
   0x2   :  { %v180_v5 = vpack.c.bf16 %v22_v2, %v21_v1  ;;  %v24_v6 = vld [vmem:[%s286_s1 + $0x18] sm:$0xff]  ;;  %v25_v8 = vld [vmem:[%s286_s1 + $0x20] sm:$0xff]  ;;  %v26_v9 = vld [vmem:[%s286_s1 + $0x28] sm:$0xff] }
   0x3   :  { %v183_v7 = vpack.c.bf16 %v24_v6, %v23_v3  ;;  %v186_v10 = vpack.c.bf16 %v26_v9, %v25_v8  ;;  %v27_v11 = vld [vmem:[%s286_s1 + $0x30] sm:$0xff]  ;;  %v28_v12 = vld [vmem:[%s286_s1 + $0x38] sm:$0xff]  ;;  %v29_v14 = vld [vmem:[%s286_s1 + $0x40] sm:$0xff] }
   0x4   :  { %181 = vmatpush3.bf16.msra.mxu0 %v180_v5  ;;  %v189_v13 = vpack.c.bf16 %v28_v12, %v27_v11  ;;  %v30_v15 = vld [vmem:[%s286_s1 + $0x48] sm:$0xff]  ;;  %v31_v17 = vld [vmem:[%s286_s1 + $0x50] sm:$0xff]  ;;  %v32_v18 = vld [vmem:[%s286_s1 + $0x58] sm:$0xff] }
   0x5   :  { %182 = vmatprep.subr.bf16.mxu0 %v206_v0  ;;  %v192_v16 = vpack.c.bf16 %v30_v15, %v29_v14  ;;  %v195_v19 = vpack.c.bf16 %v32_v18, %v31_v17  ;;  %v33_v20 = vld [vmem:[%s286_s1 + $0x60] sm:$0xff]  ;;  %v34_v21 = vld [vmem:[%s286_s1 + $0x68] sm:$0xff]  ;;  %v35_v23 = vld [vmem:[%s286_s1 + $0x70] sm:$0xff] }
   0x6   :  { %v198_v22 = vpack.c.bf16 %v34_v21, %v33_v20  ;;  %v36_v24 = vld [vmem:[%s286_s1 + $0x78] sm:$0xff]  ;;  %v20_v26 = vld [vmem:[%s287_s0] sm:$0xff] }
   0x7   :  { %v201_v25 = vpack.c.bf16 %v36_v24, %v35_v23  ;;  %v126_v27 = vld [vmem:[%s288_s2] ss:$0 sm:$0xff] }
   0x8   :  { %184 = vmatpush3.bf16.msra.mxu0 %v183_v7 }
   0x9   :  { %185 = vmatprep.subr.bf16.mxu0 %v206_v0 }
   0xc   :  { %187 = vmatpush3.bf16.msra.mxu0 %v186_v10 }
   0xd   :  { %188 = vmatprep.subr.bf16.mxu0 %v206_v0 }
  0x10   :  { %190 = vmatpush3.bf16.msra.mxu0 %v189_v13 }
  0x11   :  { %191 = vmatprep.subr.bf16.mxu0 %v206_v0 }
  0x14   :  { %193 = vmatpush3.bf16.msra.mxu0 %v192_v16 }
  0x15   :  { %194 = vmatprep.subr.bf16.mxu0 %v206_v0 }
  0x18   :  { %196 = vmatpush3.bf16.msra.mxu0 %v195_v19 }
  0x19   :  { %197 = vmatprep.subr.bf16.mxu0 %v206_v0 }
  0x1c   :  { %199 = vmatpush3.bf16.msra.mxu0 %v198_v22 }
  0x1d   :  { %200 = vmatprep.subr.bf16.mxu0 %v206_v0 }
  0x20   :  { %202 = vmatpush3.bf16.msra.mxu0 %v201_v25 }
  0x23   :  { %177 = vmatmul.mubr.f32.vlgmr.msra.gmra.mrb[0].mxu0 %v20_v26 }
  0xf6   :  { %v103_v28 = vpop.f32.mrb[0].mxu0 }
  0xf7   :  { %v120_v29 = vadd.f32 %v126_v27, %v103_v28  ;;  %v178_v30 = vpop.f32.mrb[1].mxu0 }
  0xf9   :  { %121 = vst [vmem:[%s289_s3] sm:$0xff] %v120_v29 }

</bundles_post_ra>
